<compile_context>
chip_gen: v7x
topology: tpu7x:2x2x1
jax: 0.10.0
libtpu: 0.0.40
codegen_flags: <defaults>
</compile_context>

<pallas_src>
import functools

import jax
import jax.numpy as jnp
from jax.experimental import pallas as pl
from jax.experimental.pallas import tpu as pltpu

LEAKY_SLOPE = 0.01


def _round_up(x, m):
    return ((x + m - 1) // m) * m


def _leaky_relu(x, slope=LEAKY_SLOPE):
    return jnp.where(x > 0, x, slope * x)


def _discriminator_kernel(x_ref,
                          w1_ref, b1_ref,
                          w2_ref, b2_ref,
                          w3_ref, b3_ref,
                          w4t_ref, b4_ref,
                          out_ref,
                          *, apply_sigmoid: bool):
    nc = x_ref.shape[1]
    x = x_ref[...]  # f32 batch tile, (tile_b, nc)

    # ---- Layer 1: Linear(nc, nf) + LeakyReLU ---------------------------------
    # nc is tiny (4): a K=4 MXU contraction pads to a near-empty 128-deep pass,
    # so do it as `nc` broadcast-FMAs on the VPU in f32 (w1/b1 are stored f32).
    if nc <= 8:
        h = x[:, 0:1] * w1_ref[0:1, :] + b1_ref[...]
        for k in range(1, nc):  # static unroll; nc is a compile-time constant
            h = h + x[:, k:k + 1] * w1_ref[k:k + 1, :]
    else:
        h = (jnp.dot(x, w1_ref[...], preferred_element_type=jnp.float32)
             + b1_ref[...])
    h = _leaky_relu(h)

    # ---- Layer 2: Linear(nf, 2nf) + LeakyReLU (MXU, f32 accumulate) ----------
    h = (jnp.dot(h.astype(w2_ref.dtype), w2_ref[...],
                 preferred_element_type=jnp.float32)
         + b2_ref[...])
    h = _leaky_relu(h)

    # ---- Layer 3: Linear(2nf, 4nf) + LeakyReLU (MXU, f32 accumulate) ---------
    h = (jnp.dot(h.astype(w3_ref.dtype), w3_ref[...],
                 preferred_element_type=jnp.float32)
         + b3_ref[...])
    h = _leaky_relu(h)

    # ---- Layer 4: Linear(4nf, 1) as VPU multiply + lane reduction ------------
    # h: (tile_b, 4nf) f32, w4t: (1, 4nf) f32 -> logit (tile_b, 1).
    logit = jnp.sum(h * w4t_ref[...], axis=-1, keepdims=True) + b4_ref[...]

    if apply_sigmoid:
        # sigmoid(x) = 0.5 * (tanh(x/2) + 1); tanh rides the EUP slot and is
        # applied only to the single real logit column.
        logit = 0.5 * (jnp.tanh(0.5 * logit) + 1.0)

    out_ref[...] = logit.astype(out_ref.dtype)


def prepare_params(params, compute_dtype=jnp.float32):
    """One-time (per parameter update) layout/cast prep, hoisted out of the
    forward call.

    params: w1..w4 as (in, out) [transposed vs. PyTorch], b1..b4 as (1, out).
    Returns: MXU-layer weights in compute_dtype, everything else f32, and the
    final (4nf, 1) weight flattened to a (1, 4nf) lane-vector for the VPU/XLU
    reduction path.
    """
    nf4 = params["w4"].shape[0]
    return {
        "w1": params["w1"].astype(jnp.float32),   # layer 1 runs on the VPU in f32
        "b1": params["b1"].astype(jnp.float32),
        "w2": params["w2"].astype(compute_dtype),
        "b2": params["b2"].astype(jnp.float32),
        "w3": params["w3"].astype(compute_dtype),
        "b3": params["b3"].astype(jnp.float32),
        "w4t": params["w4"].reshape(1, nf4).astype(jnp.float32),
        "b4": params["b4"].reshape(1, 1).astype(jnp.float32),
    }


def discriminator_forward(x, prepared, *, apply_sigmoid=True, tile_b=None):
    """Fused discriminator MLP as a single batch-tiled Pallas TPU kernel.

    x: (B, nc) or (B, nc, 1, 1, ...) — trailing singleton dims are flattened,
       mirroring torch.reshape(x, (B, nc)).  Kept in f32 (no wrapper cast).
    prepared: output of prepare_params().
    """
    B = x.shape[0]
    nc = prepared["w1"].shape[0]
    nf = prepared["w1"].shape[1]
    nf4 = prepared["w4t"].shape[1]
    x = jnp.reshape(x, (B, nc)).astype(jnp.float32)

    b8 = _round_up(B, 8)
    if tile_b is None:
        if b8 <= 16:
            tile_b = b8                      # tiny batch: single tile
        else:
            # >= 2 tiles so the "parallel" batch axis can shard across both
            # TensorCores on v7x; cap the tile to amortize ~0.35 us/step
            # overhead while keeping per-tile activation VMEM ~2 MB.
            tile_b = min(2048, _round_up(-(-b8 // 2), 8))
    tile_b = max(8, _round_up(tile_b, 8))
    b_pad = _round_up(B, tile_b)
    if b_pad != B:
        # Padded rows flow through the net (cheap) and are sliced off below.
        x = jnp.pad(x, ((0, b_pad - B), (0, 0)))

    operands = (x,
                prepared["w1"], prepared["b1"],
                prepared["w2"], prepared["b2"],
                prepared["w3"], prepared["b3"],
                prepared["w4t"], prepared["b4"])

    # x / out stream per batch tile; weights & biases are whole-array resident
    # blocks (constant index map -> DMA'd once, no re-copy across grid steps).
    resident = lambda a: pl.BlockSpec(a.shape, lambda i: (0, 0))
    in_specs = [pl.BlockSpec((tile_b, nc), lambda i: (i, 0))]
    in_specs += [resident(a) for a in operands[1:]]
    # Narrow output: (tile_b, 1) — block last dim equals the full array dim.
    out_spec = pl.BlockSpec((tile_b, 1), lambda i: (i, 0))

    flops = 2 * b_pad * (nc * nf + nf * 2 * nf + 2 * nf * nf4 + nf4)
    bytes_accessed = (sum(int(a.size) * a.dtype.itemsize for a in operands)
                      + b_pad * 4)

    kernel = functools.partial(_discriminator_kernel,
                               apply_sigmoid=apply_sigmoid)

    out = pl.pallas_call(
        kernel,
        out_shape=jax.ShapeDtypeStruct((b_pad, 1), jnp.float32),
        grid=(b_pad // tile_b,),
        in_specs=in_specs,
        out_specs=out_spec,
        compiler_params=pltpu.CompilerParams(
            # Independent batch tiles -> shard across both TCs on v7x.
            dimension_semantics=("parallel",)),
        cost_estimate=pl.CostEstimate(
            flops=flops,
            transcendentals=b_pad if apply_sigmoid else 0,
            bytes_accessed=bytes_accessed),
    )(*operands)

    return out[:B]


def init_params(key, nc, nf):
    """Deterministic synthetic weights (PyTorch Linear-style uniform init),
    stored transposed relative to PyTorch: w as (in, out), b as (1, out)."""
    dims = [(nc, nf), (nf, 2 * nf), (2 * nf, 4 * nf), (4 * nf, 1)]
    params = {}
    for i, (fan_in, fan_out) in enumerate(dims, start=1):
        key, kw, kb = jax.random.split(key, 3)
        bound = 1.0 / jnp.sqrt(jnp.float32(fan_in))
        params[f"w{i}"] = jax.random.uniform(
            kw, (fan_in, fan_out), jnp.float32, -bound, bound)
        params[f"b{i}"] = jax.random.uniform(
            kb, (1, fan_out), jnp.float32, -bound, bound)
    return params


def reference_forward(x, params, apply_sigmoid=True):
    h = x
    for i in range(1, 4):
        h = h @ params[f"w{i}"] + params[f"b{i}"]
        h = jnp.where(h > 0, h, LEAKY_SLOPE * h)
    out = h @ params["w4"] + params["b4"]
    if apply_sigmoid:
        out = jax.nn.sigmoid(out)
    return out


if __name__ == "__main__":
    key = jax.random.PRNGKey(0)
    nc, nf = 4, 32  # problem.nc = 4, problem.nf = 32

    # --- small batch, single tile -------------------------------------------
    B = 8
    k_x, k_p, k_x2 = jax.random.split(key, 3)
    # Module reshapes (B, nc, ...) -> (B, nc); start from (B, nc, 1, 1).
    x4d = jax.random.normal(k_x, (B, nc, 1, 1), jnp.float32)
    params = init_params(k_p, nc, nf)

    ref = reference_forward(jnp.reshape(x4d, (B, nc)), params,
                            apply_sigmoid=True)

    # f32 compute path (strict correctness check).
    prep_f32 = prepare_params(params, compute_dtype=jnp.float32)
    out_f32 = discriminator_forward(x4d, prep_f32, apply_sigmoid=True)
    out_f32 = jax.block_until_ready(out_f32)
    assert out_f32.shape == (B, 1)
    assert jnp.allclose(out_f32, ref, atol=1e-4, rtol=1e-4)

    # bf16 MXU-layer path (v6e/v7x option); looser tolerance.
    prep_bf16 = prepare_params(params, compute_dtype=jnp.bfloat16)
    out_bf16 = discriminator_forward(x4d, prep_bf16, apply_sigmoid=True)
    out_bf16 = jax.block_until_ready(out_bf16)
    assert out_bf16.shape == (B, 1)
    assert jnp.allclose(out_bf16, ref, atol=5e-2, rtol=5e-2)

    # --- larger batch: exercises padding + >=2 grid steps (v7x TC sharding) --
    B2 = 300
    x2 = jax.random.normal(k_x2, (B2, nc, 1, 1), jnp.float32)
    ref2 = reference_forward(jnp.reshape(x2, (B2, nc)), params,
                             apply_sigmoid=True)
    out2 = discriminator_forward(x2, prep_f32, apply_sigmoid=True)
    out2 = jax.block_until_ready(out2)
    assert out2.shape == (B2, 1)
    assert jnp.allclose(out2, ref2, atol=1e-4, rtol=1e-4)

    print("KERNEL_OK")
</pallas_src>

<mosaic_0001>
module attributes {stable_mosaic.version = 11 : i64} {
  func.func @_discriminator_kernel(%arg0: i32, %arg1: memref<8x4xf32, #tpu.memory_space<vmem>>, %arg2: memref<4x32xf32, #tpu.memory_space<vmem>>, %arg3: memref<1x32xf32, #tpu.memory_space<vmem>>, %arg4: memref<32x64xf32, #tpu.memory_space<vmem>>, %arg5: memref<1x64xf32, #tpu.memory_space<vmem>>, %arg6: memref<64x128xf32, #tpu.memory_space<vmem>>, %arg7: memref<1x128xf32, #tpu.memory_space<vmem>>, %arg8: memref<1x128xf32, #tpu.memory_space<vmem>>, %arg9: memref<1x1xf32, #tpu.memory_space<vmem>>, %arg10: memref<8x1xf32, #tpu.memory_space<vmem>>) attributes {dimension_semantics = [#tpu.dimension_semantics<parallel>], iteration_bounds = array<i64: 1>, scalar_prefetch = 0 : i64, scratch_operands = 0 : i64, tpu.core_type = #tpu.core_type<tc>, window_params = [{transform_indices = @transform_0, window_bounds = array<i64: 8, 4>}, {pipeline_mode = #tpu.pipeline_mode<synchronous>, transform_indices = @transform_1, window_bounds = array<i64: 4, 32>}, {pipeline_mode = #tpu.pipeline_mode<synchronous>, transform_indices = @transform_2, window_bounds = array<i64: 1, 32>}, {pipeline_mode = #tpu.pipeline_mode<synchronous>, transform_indices = @transform_3, window_bounds = array<i64: 32, 64>}, {pipeline_mode = #tpu.pipeline_mode<synchronous>, transform_indices = @transform_4, window_bounds = array<i64: 1, 64>}, {pipeline_mode = #tpu.pipeline_mode<synchronous>, transform_indices = @transform_5, window_bounds = array<i64: 64, 128>}, {pipeline_mode = #tpu.pipeline_mode<synchronous>, transform_indices = @transform_6, window_bounds = array<i64: 1, 128>}, {pipeline_mode = #tpu.pipeline_mode<synchronous>, transform_indices = @transform_7, window_bounds = array<i64: 1, 128>}, {pipeline_mode = #tpu.pipeline_mode<synchronous>, transform_indices = @transform_8, window_bounds = array<i64: 1, 1>}, {transform_indices = @transform_9, window_bounds = array<i64: 8, 1>}]} {
    %c0 = arith.constant 0 : index
    %c0_0 = arith.constant 0 : index
    %0 = vector.load %arg1[%c0, %c0_0] : memref<8x4xf32, #tpu.memory_space<vmem>>, vector<8x4xf32>
    %1 = vector.extract_strided_slice %0 {offsets = [0, 0], sizes = [8, 1], strides = [1, 1]} : vector<8x4xf32> to vector<8x1xf32>
    %c0_1 = arith.constant 0 : index
    %c0_2 = arith.constant 0 : index
    %2 = vector.load %arg2[%c0_1, %c0_2] : memref<4x32xf32, #tpu.memory_space<vmem>>, vector<1x32xf32>
    %3 = vector.broadcast %1 : vector<8x1xf32> to vector<8x32xf32>
    %4 = vector.broadcast %2 : vector<1x32xf32> to vector<8x32xf32>
    %5 = arith.mulf %3, %4 : vector<8x32xf32>
    %c0_3 = arith.constant 0 : index
    %c0_4 = arith.constant 0 : index
    %6 = vector.load %arg3[%c0_3, %c0_4] : memref<1x32xf32, #tpu.memory_space<vmem>>, vector<1x32xf32>
    %7 = vector.broadcast %6 : vector<1x32xf32> to vector<8x32xf32>
    %8 = arith.addf %5, %7 : vector<8x32xf32>
    %9 = vector.extract_strided_slice %0 {offsets = [0, 1], sizes = [8, 1], strides = [1, 1]} : vector<8x4xf32> to vector<8x1xf32>
    %c1 = arith.constant 1 : index
    %c0_5 = arith.constant 0 : index
    %10 = vector.load %arg2[%c1, %c0_5] : memref<4x32xf32, #tpu.memory_space<vmem>>, vector<1x32xf32>
    %11 = vector.broadcast %9 : vector<8x1xf32> to vector<8x32xf32>
    %12 = vector.broadcast %10 : vector<1x32xf32> to vector<8x32xf32>
    %13 = arith.mulf %11, %12 : vector<8x32xf32>
    %14 = arith.addf %8, %13 : vector<8x32xf32>
    %15 = vector.extract_strided_slice %0 {offsets = [0, 2], sizes = [8, 1], strides = [1, 1]} : vector<8x4xf32> to vector<8x1xf32>
    %c2 = arith.constant 2 : index
    %c0_6 = arith.constant 0 : index
    %16 = vector.load %arg2[%c2, %c0_6] : memref<4x32xf32, #tpu.memory_space<vmem>>, vector<1x32xf32>
    %17 = vector.broadcast %15 : vector<8x1xf32> to vector<8x32xf32>
    %18 = vector.broadcast %16 : vector<1x32xf32> to vector<8x32xf32>
    %19 = arith.mulf %17, %18 : vector<8x32xf32>
    %20 = arith.addf %14, %19 : vector<8x32xf32>
    %21 = vector.extract_strided_slice %0 {offsets = [0, 3], sizes = [8, 1], strides = [1, 1]} : vector<8x4xf32> to vector<8x1xf32>
    %c3 = arith.constant 3 : index
    %c0_7 = arith.constant 0 : index
    %22 = vector.load %arg2[%c3, %c0_7] : memref<4x32xf32, #tpu.memory_space<vmem>>, vector<1x32xf32>
    %23 = vector.broadcast %21 : vector<8x1xf32> to vector<8x32xf32>
    %24 = vector.broadcast %22 : vector<1x32xf32> to vector<8x32xf32>
    %25 = arith.mulf %23, %24 : vector<8x32xf32>
    %26 = arith.addf %20, %25 : vector<8x32xf32>
    %cst = arith.constant 0.000000e+00 : f32
    %27 = vector.broadcast %cst : f32 to vector<8x32xf32>
    %28 = arith.cmpf ogt, %26, %27 : vector<8x32xf32>
    %cst_8 = arith.constant 0.00999999977 : f32
    %29 = vector.broadcast %cst_8 : f32 to vector<8x32xf32>
    %30 = arith.mulf %29, %26 : vector<8x32xf32>
    %31 = arith.select %28, %26, %30 : vector<8x32xi1>, vector<8x32xf32>
    %c0_9 = arith.constant 0 : index
    %c0_10 = arith.constant 0 : index
    %32 = vector.load %arg4[%c0_9, %c0_10] : memref<32x64xf32, #tpu.memory_space<vmem>>, vector<32x64xf32>
    %cst_11 = arith.constant dense<0.000000e+00> : vector<8x64xf32>
    %33 = tpu.matmul %31, %32, %cst_11 {dimension_numbers = #tpu.dot_dimension_numbers<[1], [0], [0], [1], [0, 0, 1, 1], [], []>} : vector<8x32xf32>, vector<32x64xf32>, vector<8x64xf32> -> vector<8x64xf32>
    %c0_12 = arith.constant 0 : index
    %c0_13 = arith.constant 0 : index
    %34 = vector.load %arg5[%c0_12, %c0_13] : memref<1x64xf32, #tpu.memory_space<vmem>>, vector<1x64xf32>
    %35 = vector.broadcast %34 : vector<1x64xf32> to vector<8x64xf32>
    %36 = arith.addf %33, %35 : vector<8x64xf32>
    %cst_14 = arith.constant 0.000000e+00 : f32
    %37 = vector.broadcast %cst_14 : f32 to vector<8x64xf32>
    %38 = arith.cmpf ogt, %36, %37 : vector<8x64xf32>
    %cst_15 = arith.constant 0.00999999977 : f32
    %39 = vector.broadcast %cst_15 : f32 to vector<8x64xf32>
    %40 = arith.mulf %39, %36 : vector<8x64xf32>
    %41 = arith.select %38, %36, %40 : vector<8x64xi1>, vector<8x64xf32>
    %c0_16 = arith.constant 0 : index
    %c0_17 = arith.constant 0 : index
    %42 = vector.load %arg6[%c0_16, %c0_17] : memref<64x128xf32, #tpu.memory_space<vmem>>, vector<64x128xf32>
    %cst_18 = arith.constant dense<0.000000e+00> : vector<8x128xf32>
    %43 = tpu.matmul %41, %42, %cst_18 {dimension_numbers = #tpu.dot_dimension_numbers<[1], [0], [0], [1], [0, 0, 1, 1], [], []>} : vector<8x64xf32>, vector<64x128xf32>, vector<8x128xf32> -> vector<8x128xf32>
    %c0_19 = arith.constant 0 : index
    %c0_20 = arith.constant 0 : index
    %44 = vector.load %arg7[%c0_19, %c0_20] : memref<1x128xf32, #tpu.memory_space<vmem>>, vector<1x128xf32>
    %45 = vector.broadcast %44 : vector<1x128xf32> to vector<8x128xf32>
    %46 = arith.addf %43, %45 : vector<8x128xf32>
    %cst_21 = arith.constant 0.000000e+00 : f32
    %47 = vector.broadcast %cst_21 : f32 to vector<8x128xf32>
    %48 = arith.cmpf ogt, %46, %47 : vector<8x128xf32>
    %cst_22 = arith.constant 0.00999999977 : f32
    %49 = vector.broadcast %cst_22 : f32 to vector<8x128xf32>
    %50 = arith.mulf %49, %46 : vector<8x128xf32>
    %51 = arith.select %48, %46, %50 : vector<8x128xi1>, vector<8x128xf32>
    %c0_23 = arith.constant 0 : index
    %c0_24 = arith.constant 0 : index
    %52 = vector.load %arg8[%c0_23, %c0_24] : memref<1x128xf32, #tpu.memory_space<vmem>>, vector<1x128xf32>
    %53 = vector.broadcast %52 : vector<1x128xf32> to vector<8x128xf32>
    %54 = arith.mulf %51, %53 : vector<8x128xf32>
    %cst_25 = arith.constant dense<0.000000e+00> : vector<8xf32>
    %55 = vector.multi_reduction <add>, %54, %cst_25 [1] : vector<8x128xf32> to vector<8xf32>
    %56 = vector.shape_cast %55 : vector<8xf32> to vector<8x1xf32>
    %c0_26 = arith.constant 0 : index
    %c0_27 = arith.constant 0 : index
    %57 = vector.load %arg9[%c0_26, %c0_27] : memref<1x1xf32, #tpu.memory_space<vmem>>, vector<1x1xf32>
    %58 = vector.broadcast %57 : vector<1x1xf32> to vector<8x1xf32>
    %59 = arith.addf %56, %58 : vector<8x1xf32>
    %cst_28 = arith.constant 5.000000e-01 : f32
    %60 = vector.broadcast %cst_28 : f32 to vector<8x1xf32>
    %61 = arith.mulf %60, %59 : vector<8x1xf32>
    %62 = math.tanh %61 : vector<8x1xf32>
    %cst_29 = arith.constant 1.000000e+00 : f32
    %63 = vector.broadcast %cst_29 : f32 to vector<8x1xf32>
    %64 = arith.addf %62, %63 : vector<8x1xf32>
    %cst_30 = arith.constant 5.000000e-01 : f32
    %65 = vector.broadcast %cst_30 : f32 to vector<8x1xf32>
    %66 = arith.mulf %65, %64 : vector<8x1xf32>
    %c0_31 = arith.constant 0 : index
    %c0_32 = arith.constant 0 : index
    %67 = vector.load %arg10[%c0_31, %c0_32] : memref<8x1xf32, #tpu.memory_space<vmem>>, vector<8x1xf32>
    tpu.vector_store %arg10[%c0_31, %c0_32], %66 {strides = array<i32>} : memref<8x1xf32, #tpu.memory_space<vmem>>, vector<8x1xf32>,
    return
  }
  func.func @transform_0(%arg0: i32) -> (i32, i32) {
    %c0_i32 = arith.constant 0 : i32
    %c0_i32_0 = arith.constant 0 : i32
    return %arg0, %c0_i32 : i32, i32
  }
  func.func @transform_1(%arg0: i32) -> (i32, i32) {
    %c0_i32 = arith.constant 0 : i32
    %c0_i32_0 = arith.constant 0 : i32
    %c0_i32_1 = arith.constant 0 : i32
    return %c0_i32, %c0_i32_0 : i32, i32
  }
  func.func @transform_2(%arg0: i32) -> (i32, i32) {
    %c0_i32 = arith.constant 0 : i32
    %c0_i32_0 = arith.constant 0 : i32
    %c0_i32_1 = arith.constant 0 : i32
    return %c0_i32, %c0_i32_0 : i32, i32
  }
  func.func @transform_3(%arg0: i32) -> (i32, i32) {
    %c0_i32 = arith.constant 0 : i32
    %c0_i32_0 = arith.constant 0 : i32
    %c0_i32_1 = arith.constant 0 : i32
    return %c0_i32, %c0_i32_0 : i32, i32
  }
  func.func @transform_4(%arg0: i32) -> (i32, i32) {
    %c0_i32 = arith.constant 0 : i32
    %c0_i32_0 = arith.constant 0 : i32
    %c0_i32_1 = arith.constant 0 : i32
    return %c0_i32, %c0_i32_0 : i32, i32
  }
  func.func @transform_5(%arg0: i32) -> (i32, i32) {
    %c0_i32 = arith.constant 0 : i32
    %c0_i32_0 = arith.constant 0 : i32
    %c0_i32_1 = arith.constant 0 : i32
    return %c0_i32, %c0_i32_0 : i32, i32
  }
  func.func @transform_6(%arg0: i32) -> (i32, i32) {
    %c0_i32 = arith.constant 0 : i32
    %c0_i32_0 = arith.constant 0 : i32
    %c0_i32_1 = arith.constant 0 : i32
    return %c0_i32, %c0_i32_0 : i32, i32
  }
  func.func @transform_7(%arg0: i32) -> (i32, i32) {
    %c0_i32 = arith.constant 0 : i32
    %c0_i32_0 = arith.constant 0 : i32
    %c0_i32_1 = arith.constant 0 : i32
    return %c0_i32, %c0_i32_0 : i32, i32
  }
  func.func @transform_8(%arg0: i32) -> (i32, i32) {
    %c0_i32 = arith.constant 0 : i32
    %c0_i32_0 = arith.constant 0 : i32
    %c0_i32_1 = arith.constant 0 : i32
    return %c0_i32, %c0_i32_0 : i32, i32
  }
  func.func @transform_9(%arg0: i32) -> (i32, i32) {
    %c0_i32 = arith.constant 0 : i32
    %c0_i32_0 = arith.constant 0 : i32
    return %arg0, %c0_i32 : i32, i32
  }
}

</mosaic_0001>

<bundles_post_ra>
// kernel: tpu_custom_call.1
= control target key start
LH: loop header
LB: loop body
LE: loop exit
PB: predicated region body
PF: predicated region fallthrough
CT: control target
= control target key end

     0   :  { %s585_s0 = inlined_call_operand.vmem [shape: f32[8,4], index: 0, kind: input, shape index: {}]   ;;  %s586_s1 = inlined_call_operand.vmem [shape: f32[4,32], index: 1, kind: input, shape index: {}]   ;;  %s587_s2 = inlined_call_operand.vmem [shape: f32[1,32], index: 2, kind: input, shape index: {}]   ;;  %s588_s3 = inlined_call_operand.hbm [shape: f32[32,64], index: 3, kind: input, shape index: {}]   ;;  %s589_s4 = inlined_call_operand.vmem [shape: f32[1,64], index: 4, kind: input, shape index: {}]   ;;  %s590_s5 = inlined_call_operand.hbm [shape: f32[64,128], index: 5, kind: input, shape index: {}]   ;;  %s591_s6 = inlined_call_operand.vmem [shape: f32[1,128], index: 6, kind: input, shape index: {}]   ;;  %s592_s7 = inlined_call_operand.vmem [shape: f32[1,128], index: 7, kind: input, shape index: {}]   ;;  %s593_s8 = inlined_call_operand.<no memory space> [shape: f32[1,1], index: 8, kind: input, shape index: {}]   ;;  %s594_s9 = inlined_call_operand.vmem [shape: f32[8,1], index: 9, kind: output, shape index: {}]  }
   0x1   :  { %v14_v0 = vstv %s593_s8 }
   0x2   :  { %15 = vst [vmem:[#allocation2] sm:$0x1] %v14_v0 }
   0x3   :  { %16 = vsyncpa [#allocation4], 0 }
   0x4   :  { %17 = vsyncpa [#allocation6], 0  ;;  %s467_s11 = smov [#allocation3]   ;;  %s419_s15 = scalar_lea.hbm %s588_s3, 512 }
   0x5   :  { %s29_s12 = sshll.u32 %s467_s11, 4  ;;  %p420_p0 = scmp.ne.s32.totalorder %s588_s3, %s419_s15  ;;  %s30_s12 = int_to_ptr.vmem [resolvable:$true] %s29_s12 }
   0x6   :  { %p423_p1 = scmp.lt.u32.totalorder %s419_s15, %s588_s3 }
   0x8   :  { %p425_p2 = pnand %p423_p1, %p420_p0 }
   0xa   :  { %428 = shalt.err (!%p425_p2)
}
   0xb   :  { %s429_s8 = scalar_lea.vmem %s30_s12, 512  ;;  %p434_p4 = scmp.lt.s32.totalorder %s30_s12, %s30_s12 }
   0xc   :  { %p430_p3 = scmp.ne.s32.totalorder %s30_s12, %s429_s8  ;;  %p435_p5 = scmp.lt.s32.totalorder %s429_s8, %s429_s8 }
   0xe   :  { %p436_p6 = por %p435_p5, %p434_p4 }
  0x10   :  { %p437_p7 = pnand %p436_p6, %p430_p3 }
  0x12   :  { %440 = shalt.err (!%p437_p7)
}
  0x13   :  { %s468_s20 = smov 128   ;;  %s469_s21 = smov 8  }
  0x14   :  { %35 = dma.hbm_to_vmem [thread:$0]  %s588_s3, 512, %s30_s12, [#allocation4], %s468_s20, %s468_s20, %s469_s21  }
  0x15   :  { %s470_s24 = smov [#allocation5]   ;;  %s441_s28 = scalar_lea.hbm %s590_s5, 1024 }
  0x16   :  { %s43_s25 = sshll.u32 %s470_s24, 4  ;;  %p442_p8 = scmp.ne.s32.totalorder %s590_s5, %s441_s28  ;;  %s44_s25 = int_to_ptr.vmem [resolvable:$true] %s43_s25 }
  0x17   :  { %p445_p9 = scmp.lt.u32.totalorder %s441_s28, %s590_s5 }
  0x19   :  { %p447_p10 = pnand %p445_p9, %p442_p8 }
  0x1b   :  { %450 = shalt.err (!%p447_p10)
}
  0x1c   :  { %s451_s13 = scalar_lea.vmem %s44_s25, 1024  ;;  %p456_p12 = scmp.lt.s32.totalorder %s44_s25, %s44_s25 }
  0x1d   :  { %p452_p11 = scmp.ne.s32.totalorder %s44_s25, %s451_s13  ;;  %p457_p13 = scmp.lt.s32.totalorder %s451_s13, %s451_s13 }
  0x1f   :  { %p458_p0 = por %p457_p13, %p456_p12 }
  0x21   :  { %p459_p1 = pnand %p458_p0, %p452_p11 }
  0x23   :  { %462 = shalt.err (!%p459_p1)
}
  0x24   :  { %49 = dma.hbm_to_vmem [thread:$0]  %s590_s5, 1024, %s44_s25, [#allocation6], %s468_s20, %s468_s20, %s469_s21  }
  0x25   :  { %463 = dma.done.wait [#allocation4], 512  }
  0x26   :  { %464 = vsyncadd [#allocation4], 4294966784 }
  0x27   :  { %465 = dma.done.wait [#allocation6], 1024  }
  0x28   :  { %466 = vsyncadd [#allocation6], 4294966272  ;;  %v471_v1 = vmov 0   ;;  %v472_v2 = vmov 2   ;;  %v62_v3 = vld [vmem:[%s585_s0] sm:$0xff]  ;;  %v473_v4 = vmov 1  }
  0x29   :  { %412 = vset.pattern.permute.xlu0 %v471_v1  ;;  %414 = vset.pattern.permute.xlu1 %v472_v2  ;;  %v474_v5 = vmov 3   ;;  %v118_v6 = vld [vmem:[#allocation3] sm:$0xff]  ;;  %v119_v7 = vld [vmem:[#allocation3 + $0x8] sm:$0xff]  ;;  %v475_v9 = vmov 0.0|0.0   ;;  %v120_v10 = vld [vmem:[#allocation3 + $0x10] sm:$0xff]  ;;  %vm476_vm0 = vmmov 0  }
  0x2a   :  { %66 = vperm.xlu0 %412, %v62_v3   ;;  %95 = vperm.xlu1 %414, %v62_v3   ;;  %v384_v8 = vpack.c.bf16 %v119_v7, %v118_v6  ;;  %v121_v11 = vld [vmem:[#allocation3 + $0x18] sm:$0xff]  ;;  %v477_v13 = vmov 0.0   ;;  %v206_v14 = vld [vmem:[#allocation5] sm:$0xff]  ;;  %v207_v15 = vld [vmem:[#allocation5 + $0x8] sm:$0xff]  ;;  %vm129_vm2 = vcmask 261120   ;;  %vm221_vm4 = vcmask 523264  }
  0x2b   :  { %383 = vmatprep.subr.bf16.mxu0 %v475_v9  ;;  %389 = vmatprep.subr.bf16.mxu1 %v475_v9  ;;  %v387_v12 = vpack.c.bf16 %v121_v11, %v120_v10  ;;  %v208_v16 = vld [vmem:[#allocation5 + $0x10] sm:$0xff]  ;;  %v390_v17 = vpack.c.bf16 %v207_v15, %v206_v14  ;;  %v209_v18 = vld [vmem:[#allocation5 + $0x18] sm:$0xff]  ;;  %v210_v20 = vld [vmem:[#allocation5 + $0x20] sm:$0xff]  ;;  %vm320_vm6 = vcmask 7168  }
  0x2c   :  { %385 = vmatpush3.bf16.msra.mxu0 %v384_v8  ;;  %361 = vmatprep.mubr.msk.f32.mxu0 %vm476_vm0, %v477_v13  ;;  %v393_v19 = vpack.c.bf16 %v209_v18, %v208_v16  ;;  %v211_v21 = vld [vmem:[#allocation5 + $0x28] sm:$0xff]  ;;  %v328_v23 = vld [vmem:[%s586_s1] ss:$0 sm:$0xff]  ;;  %v330_v28 = vld [vmem:[%s586_s1 + $0x1] ss:$0 sm:$0xff] }
  0x2d   :  { %386 = vmatprep.subr.bf16.mxu0 %v475_v9  ;;  %380 = vmatprep.mubr.msk.f32.mxu1 %vm476_vm0, %v477_v13  ;;  %v396_v22 = vpack.c.bf16 %v211_v21, %v210_v20  ;;  %v329_v27 = vld [vmem:[%s587_s2] ss:$0 sm:$0xff]  ;;  %v331_v29 = vld [vmem:[%s586_s1 + $0x2] ss:$0 sm:$0xff]  ;;  %v332_v31 = vld [vmem:[%s586_s1 + $0x3] ss:$0 sm:$0xff] }
  0x2e   :  { %413 = vset.pattern.permute.xlu0 %v473_v4  ;;  %415 = vset.pattern.permute.xlu1 %v474_v5  ;;  %v212_v42 = vld [vmem:[#allocation5 + $0x30] sm:$0xff]  ;;  %v213_v43 = vld [vmem:[#allocation5 + $0x38] sm:$0xff] }
  0x2f   :  { %84 = vperm.xlu0 %413, %v62_v3   ;;  %106 = vperm.xlu1 %415, %v62_v3   ;;  %v399_v44 = vpack.c.bf16 %v213_v43, %v212_v42  ;;  %v333_v45 = vld [vmem:[%s589_s4] ss:$0 sm:$0xff] }
  0x30   :  { %388 = vmatpush3.bf16.msra.mxu0 %v387_v12  ;;  %391 = vmatpush3.bf16.msra.mxu1 %v390_v17  ;;  %v335_v51 = vld [vmem:[%s591_s6] ss:$0 sm:$0xff] }
  0x31   :  { %392 = vmatprep.subr.bf16.mxu1 %v475_v9  ;;  %v337_v56 = vld [vmem:[%s592_s7] ss:$0 sm:$0xff] }
  0x32   :  { %v338_v59 = vld [vmem:[#allocation2] ss:$0 sm:$0xff] }
  0x33   :  { %416 = vset.pattern.permute.xlu0 %v474_v5 }
  0x34   :  { %394 = vmatpush3.bf16.msra.mxu1 %v393_v19 }
  0x35   :  { %395 = vmatprep.subr.bf16.mxu1 %v475_v9 }
  0x38   :  { %397 = vmatpush3.bf16.msra.mxu1 %v396_v22 }
  0x39   :  { %398 = vmatprep.subr.bf16.mxu1 %v475_v9 }
  0x3c   :  { %400 = vmatpush3.bf16.msra.mxu1 %v399_v44 }
  0xa9   :  { %v67_v24 = vpop.permute.xlu0 %66  ;;  %v96_v25 = vpop.permute.xlu1 %95 }
  0xaa   :  { %v73_v26 = vmul.f32 %v328_v23, %v67_v24  ;;  %v102_v35 = vmul.f32 %v331_v29, %v96_v25 }
  0xac   :  { %v81_v33 = vadd.f32 %v329_v27, %v73_v26 }
  0xae   :  { %v85_v30 = vpop.permute.xlu0 %84  ;;  %v107_v32 = vpop.permute.xlu1 %106 }
  0xaf   :  { %v91_v34 = vmul.f32 %v330_v28, %v85_v30  ;;  %v113_v37 = vmul.f32 %v332_v31, %v107_v32 }
  0xb1   :  { %v92_v36 = vadd.f32 %v91_v34, %v81_v33 }
  0xb3   :  { %v103_v38 = vadd.f32 %v102_v35, %v92_v36 }
  0xb5   :  { %v114_v39 = vadd.f32 %v113_v37, %v103_v38 }
  0xb7   :  { %v116_v40 = vmul.f32 0.01, %v114_v39  ;;  %vm115_vm1 = vcmp.gt.f32.partialorder %v114_v39, 0.0 }
  0xb9   :  { %v117_v41 = vsel %vm115_vm1, %v114_v39, %v116_v40 }
  0xba   :  { %362 = vmatmul.mubr.msk.f32.vlgmr.msra.gmra.mrb[0].mxu0 %vm129_vm2, %v117_v41 }
 0x18d   :  { %v199_v46 = vpop.f32.mrb[0].mxu0 }
 0x18e   :  { %v200_v47 = vadd.f32 %v333_v45, %v199_v46  ;;  %v363_v48 = vpop.f32.mrb[1].mxu0 }
 0x190   :  { %vm203_vm3 = vcmp.gt.f32.partialorder %v200_v47, 0.0  ;;  %v204_v49 = vmul.f32 0.01, %v200_v47 }
 0x192   :  { %v205_v50 = vsel %vm203_vm3, %v200_v47, %v204_v49 }
 0x193   :  { %381 = vmatmul.mubr.msk.f32.vlgmr.msra.gmra.mrb[0].mxu1 %vm221_vm4, %v205_v50 }
 0x266   :  { %v291_v52 = vpop.f32.mrb[0].mxu1 }
 0x267   :  { %v292_v53 = vadd.f32 %v335_v51, %v291_v52  ;;  %v382_v54 = vpop.f32.mrb[1].mxu1 }
 0x269   :  { %v296_v55 = vmul.f32 0.01, %v292_v53  ;;  %vm295_vm5 = vcmp.gt.f32.partialorder %v292_v53, 0.0 }
 0x26b   :  { %v297_v57 = vsel %vm295_vm5, %v292_v53, %v296_v55 }
 0x26c   :  { %v305_v58 = vmul.f32 %v337_v56, %v297_v57 }
 0x26e   :  { %306 = vadd.xlane.f32.xlu1 %v305_v58 }
 0x2fb   :  { %v307_v60 = vpop.xlane.xlu1 %306 }
 0x2fc   :  { %v315_v61 = vadd.f32 %v338_v59, %v307_v60 }
 0x2fe   :  { %v316_v62 = vmul.f32 0.5, %v315_v61 }
 0x300   :  { %417 = vtanh.f32 %v316_v62 }
 0x30a   :  { %v418_v63 = vpop.eup %417 }
 0x30b   :  { %v318_v0 = vadd.f32 1.0, %v418_v63 }
 0x30d   :  { %v319_v1 = vmul.f32 0.5, %v318_v0 }
 0x30f   :  { %321 = vst.msk [vmem:[%s594_s9] sm:$0xff] %vm320_vm6, %v319_v1 }
 0x310   :  { %326 = vsyncpa [#allocation4], 1 }
 0x311   :  { %327 = vsyncpa [#allocation6], 1 }

</bundles_post_ra>
